<compile_context>
chip_gen: v5e
topology: v5e:2x2
jax: 0.10.0
libtpu: 0.0.40
codegen_flags: <defaults>
</compile_context>

<pallas_src>
import jax
import jax.numpy as jnp
from jax.experimental import pallas as pl
from jax.experimental.pallas import tpu as pltpu

OUT_F = 3
IN_F = 23


def _fused_kernel(w_ref, x_ref, o_ref):
    # Whole-array VMEM residents; single sub-vreg tile.
    # o = w_eff * tanh(x)   (w_eff already folds 0.5 * W * b[:, None])
    o_ref[...] = w_ref[...] * jnp.tanh(x_ref[...])


def fold_params(weight, bias):
    """One-time (init-time) fold of the static parameter math.

    w_eff = 0.5 * W * b[:, None]  -> effective weight of shape [OUT_F, IN_F].
    """
    return (weight * 0.5) * bias[:, None]


def fused_forward(w_eff, x1):
    """w_eff: [OUT_F, IN_F] f32 (pre-folded), x1: [1, IN_F] f32."""
    vmem_spec = pl.BlockSpec(memory_space=pltpu.MemorySpace.VMEM)
    return pl.pallas_call(
        _fused_kernel,
        out_shape=jax.ShapeDtypeStruct((OUT_F, IN_F), jnp.float32),
        in_specs=[vmem_spec, vmem_spec],
        out_specs=vmem_spec,
    )(w_eff, x1)


if __name__ == "__main__":
    key = jax.random.PRNGKey(0)
    kw, kb, kx = jax.random.split(key, 3)

    # Deterministic parameter init (mimicking nn.Linear's uniform(-1/sqrt(fan_in), +)).
    bound = 1.0 / (IN_F ** 0.5)
    weight = jax.random.uniform(kw, (OUT_F, IN_F), jnp.float32, -bound, bound)
    bias = jax.random.uniform(kb, (OUT_F,), jnp.float32, -bound, bound)

    # One-time parameter fold (amortized outside the per-call path).
    w_eff = jax.block_until_ready(fold_params(weight, bias))

    # Input x1: [1, 23]
    x1 = jax.random.normal(kx, (1, IN_F), jnp.float32)

    out = fused_forward(w_eff, x1)
    jax.block_until_ready(out)

    # Reference check in plain JAX (original association of the module math).
    ref = (weight * 0.5) * bias[:, None] * jnp.tanh(x1)
    assert out.shape == (OUT_F, IN_F)
    assert jnp.allclose(out, ref, atol=1e-6, rtol=1e-6)

    print("KERNEL_OK")
</pallas_src>

<mosaic_0001>
module attributes {stable_mosaic.version = 11 : i64} {
  func.func @_fused_kernel(%arg0: memref<3x23xf32, #tpu.memory_space<vmem>>, %arg1: memref<1x23xf32, #tpu.memory_space<vmem>>, %arg2: memref<3x23xf32, #tpu.memory_space<vmem>>) attributes {dimension_semantics = [], scalar_prefetch = 0 : i64, scratch_operands = 0 : i64, tpu.core_type = #tpu.core_type<tc>} {
    %c0 = arith.constant 0 : index
    %c0_0 = arith.constant 0 : index
    %0 = vector.load %arg0[%c0, %c0_0] : memref<3x23xf32, #tpu.memory_space<vmem>>, vector<3x23xf32>
    %c0_1 = arith.constant 0 : index
    %c0_2 = arith.constant 0 : index
    %1 = vector.load %arg1[%c0_1, %c0_2] : memref<1x23xf32, #tpu.memory_space<vmem>>, vector<1x23xf32>
    %2 = math.tanh %1 : vector<1x23xf32>
    %3 = vector.broadcast %2 : vector<1x23xf32> to vector<3x23xf32>
    %4 = arith.mulf %0, %3 : vector<3x23xf32>
    %c0_3 = arith.constant 0 : index
    %c0_4 = arith.constant 0 : index
    %5 = vector.load %arg2[%c0_3, %c0_4] : memref<3x23xf32, #tpu.memory_space<vmem>>, vector<3x23xf32>
    tpu.vector_store %arg2[%c0_3, %c0_4], %4 {strides = array<i32>} : memref<3x23xf32, #tpu.memory_space<vmem>>, vector<3x23xf32>,
    return
  }
}

</mosaic_0001>

<bundles_post_ra>
// kernel: tpu_custom_call.1
= control target key start
LH: loop header
LB: loop body
LE: loop exit
PB: predicated region body
PF: predicated region fallthrough
CT: control target
= control target key end

     0   :  { %7 = vsyncpa [#allocation3], 0  ;;  %s177_s0 = inlined_call_operand.hbm [shape: f32[3,23], index: 0, kind: input, shape index: {}]   ;;  %s178_s1 = inlined_call_operand.hbm [shape: f32[1,23], index: 1, kind: input, shape index: {}]   ;;  %s179_s2 = inlined_call_operand.hbm [shape: f32[3,23], index: 2, kind: output, shape index: {}]  }
   0x1   :  { %8 = vsyncpa [#allocation6], 0 }
   0x2   :  { %9 = vsyncpa [#allocation4], 0  ;;  %s15_s11 = sshll.u32 %s177_s0, 4  ;;  %s150_s12 = smov [#allocation2]   ;;  %s16_s11 = int_to_ptr.hbm [resolvable:$true] %s15_s11 }
   0x3   :  { %s17_s13 = sshll.u32 %s150_s12, 4  ;;  %s26_s16 = sshll.u32 %s178_s1, 4  ;;  %s18_s13 = int_to_ptr.vmem [resolvable:$true] %s17_s13  ;;  %s27_s16 = int_to_ptr.hbm [resolvable:$true] %s26_s16 }
   0x4   :  { %20 = dma.hbm_to_vmem [thread:$0]  %s16_s11, 64, %s18_s13, [#allocation3]  }
   0x5   :  { %s151_s17 = smov [#allocation5]  }
   0x6   :  { %s28_s18 = sshll.u32 %s151_s17, 4  ;;  %s29_s18 = int_to_ptr.vmem [resolvable:$true] %s28_s18 }
   0x7   :  { %31 = dma.hbm_to_vmem [thread:$0]  %s27_s16, 16, %s29_s18, [#allocation6]  }
   0x8   :  { %144 = dma.done.wait [#allocation3], 64  }
   0x9   :  { %145 = vsyncadd [#allocation3], 4294967232 }
   0xa   :  { %146 = dma.done.wait [#allocation6], 16  }
   0xb   :  { %147 = vsyncadd [#allocation6], 4294967280  ;;  %v41_v0 = vld [vmem:[#allocation5] sm:$0x1]  ;;  %v40_v2 = vld [vmem:[#allocation2] sm:$0x7] }
   0xc   :  { %70 = vtanh.f32 %v41_v0  ;;  %s152_s0 = smov [#allocation7]   ;;  %s56_s1 = sshll.u32 %s179_s2, 4  ;;  %vm47_vm0 = vcmask 182272   ;;  %s57_s1 = int_to_ptr.hbm [resolvable:$true] %s56_s1 }
   0xd   :  { %s54_s19 = sshll.u32 %s152_s0, 4  ;;  %s55_s19 = int_to_ptr.vmem [resolvable:$true] %s54_s19 }
  0x12   :  { %v71_v1 = vpop.eup %70 }
  0x13   :  { %v44_v3 = vperm.slane %v71_v1, 0 }
  0x15   :  { %v46_v4 = vmul.f32 %v44_v3, %v40_v2 }
  0x17   :  { %48 = vst.msk [vmem:[#allocation7] sm:$0x7] %vm47_vm0, %v46_v4 }
  0x18   :  { %59 = dma.vmem_to_hbm [thread:$0]  %s55_s19, 64, %s57_s1, [#allocation4]  }
  0x19   :  { %148 = dma.done.wait [#allocation4], 64  }
  0x1a   :  { %149 = vsyncadd [#allocation4], 4294967232 }
  0x1b   :  { %64 = vsyncpa [#allocation3], 1 }
  0x1c   :  { %65 = vsyncpa [#allocation6], 1 }
  0x1d   :  { %66 = vsyncpa [#allocation4], 1 }

</bundles_post_ra>
